<compile_context>
chip_gen: v7x
topology: tpu7x:2x2x1
jax: 0.10.0
libtpu: 0.0.40
codegen_flags: <defaults>
</compile_context>

<pallas_src>
import jax
import jax.numpy as jnp
from jax.experimental import pallas as pl
from jax.experimental.pallas import tpu as pltpu

# ----------------------------- configuration --------------------------------
D_MODEL = 32
NUM_HEADS = 4
HEAD_DIM = D_MODEL // NUM_HEADS
HIDDEN_TIMES = 2
D_HIDDEN = D_MODEL * HIDDEN_TIMES
LN_EPS = 1e-5            # PyTorch nn.LayerNorm default
D_EXT = D_MODEL + 1      # normalized tokens + trailing ones column (row-sum on the MXU)


def _layernorm(x, w, b):
    mu = jnp.mean(x, axis=-1, keepdims=True)
    var = jnp.mean((x - mu) ** 2, axis=-1, keepdims=True)
    return (x - mu) * jax.lax.rsqrt(var + LN_EPS) * w + b


# ------------------------ prologue: norm1, hoisted ---------------------------
def _norm1_kernel(x_ref, w_ref, b_ref, o_ref):
    xn = _layernorm(x_ref[0].astype(jnp.float32), w_ref[0], b_ref[0])   # (TN, D)
    o_ref[0, :, :D_MODEL] = xn.astype(o_ref.dtype)
    o_ref[0, :, D_MODEL:] = jnp.ones((xn.shape[0], 1), o_ref.dtype)


# --------------- main: attention + proj + 2x + norm2 + MLP -------------------
def _attn_mlp_kernel(
    xq_ref,              # (1, TQ, D_EXT) bf16  normalized query tokens (+ ones col)
    xkv_ref,             # (1, TK, D_EXT) bf16  normalized kv tokens (+ ones col)
    wqk_ref,             # (H, D, D) bf16   scale * Wq_h @ Wk_h^T
    wvp_ref,             # (H, D, D) bf16   Wv_h @ Wproj_h
    bp_ref,              # (1, D)  f32
    n2w_ref, n2b_ref,    # (1, D)  f32
    w1_t_ref, b1_ref,    # (D, Dh) bf16, (1, Dh) f32
    w2_t_ref, b2_ref,    # (Dh, D) bf16, (1, D)  f32
    o_ref,               # (1, TQ, D)
    q_scr,               # (H*TQ, D) bf16   q~_h = xqn @ (scale * Wq_h Wk_h^T)
    m_scr, l_scr,        # (H*TQ, 1) f32
    acc_scr,             # (H*TQ, D) f32    token-space accumulator (Wv Wproj folded out)
):
    ki = pl.program_id(2)
    nk = pl.num_programs(2)
    H, D = NUM_HEADS, D_MODEL
    TQ = q_scr.shape[0] // H

    # ---- init (first KV tile for this (batch, q-tile)) ----
    @pl.when(ki == 0)
    def _init():
        xqn = xq_ref[0][:, :D]                                   # (TQ, D) bf16
        for h in range(H):                                       # init only: 4 tiny matmuls
            q_scr[h * TQ:(h + 1) * TQ, :] = jnp.dot(
                xqn, wqk_ref[h], preferred_element_type=jnp.float32
            ).astype(jnp.bfloat16)
        m_scr[...] = jnp.full_like(m_scr, -jnp.inf)
        l_scr[...] = jnp.zeros_like(l_scr)
        acc_scr[...] = jnp.zeros_like(acc_scr)

    # ---- online-softmax update: two 2-D MXU matmuls per KV tile ----
    xk_e = xkv_ref[0]                                            # (TK, D_EXT) bf16
    s = jnp.einsum('nd,kd->nk', q_scr[...], xk_e[:, :D],
                   preferred_element_type=jnp.float32)           # (H*TQ, TK)
    m_new = jnp.maximum(m_scr[...], jnp.max(s, axis=-1, keepdims=True))
    alpha = jnp.exp(m_scr[...] - m_new)
    p = jnp.exp(s - m_new)                                       # (H*TQ, TK) f32
    # z[:, :D] = p @ xkn  (token-space PV);  z[:, D:] = row-sum of p (ones column)
    z = jnp.dot(p.astype(jnp.bfloat16), xk_e,
                preferred_element_type=jnp.float32)              # (H*TQ, D_EXT)
    l_scr[...] = alpha * l_scr[...] + z[:, D:]
    acc_scr[...] = alpha * acc_scr[...] + z[:, :D]
    m_scr[...] = m_new

    # ---- finalize (last KV tile): proj + doubling + norm2 + MLP + residual ----
    @pl.when(ki == nk - 1)
    def _finalize():
        attn = acc_scr[...] * pl.reciprocal(l_scr[...], approx=True)   # (H*TQ, D)
        attn_b = attn.astype(jnp.bfloat16)
        proj = jnp.zeros((TQ, D), jnp.float32)
        for h in range(H):                                       # head merge, finalize only
            proj = proj + jnp.dot(attn_b[h * TQ:(h + 1) * TQ, :], wvp_ref[h],
                                  preferred_element_type=jnp.float32)
        proj = proj + bp_ref[0]
        y = proj + proj        # reference: x = attn(x); x = x + dropout1(x)  (eval mode)
        yn = _layernorm(y, n2w_ref[0], n2b_ref[0])
        h1 = jnp.dot(yn.astype(jnp.bfloat16), w1_t_ref[...],
                     preferred_element_type=jnp.float32) + b1_ref[0]
        h1 = jax.nn.gelu(h1, approximate=False)                  # exact erf GELU (nn.GELU)
        h2 = jnp.dot(h1.astype(jnp.bfloat16), w2_t_ref[...],
                     preferred_element_type=jnp.float32) + b2_ref[0]
        o_ref[0] = (y + h2).astype(o_ref.dtype)


def _choose_tile(n, target):
    """Largest sublane-aligned tile <= target that divides n (never degrades to 8/16)."""
    if n <= target:
        return n
    t = (target // 8) * 8
    while t >= 8:
        if n % t == 0:
            return t
        t -= 8
    # TODO(synk): pad N up to a tile multiple (with key masking) for awkward lengths
    # instead of falling back to one full-length tile.
    return n


def transformer_encoder_layer(x_chunks, params, *, q_tile=512, kv_tile=512, norm_tile=512):
    """x_chunks: list of [B, Ni, D] arrays. Returns list of [B, Ni, D] arrays."""
    chunk_sizes = [c.shape[1] for c in x_chunks]
    x_cat = jnp.concatenate(x_chunks, axis=1)                    # (B, N, D)
    B, N, D = x_cat.shape
    H, hd = NUM_HEADS, D // NUM_HEADS
    Dh = params["w1"].shape[0]
    scale = hd ** (-0.5)
    bdt = jnp.bfloat16
    row = lambda v: v.reshape(1, -1).astype(jnp.float32)

    # --- fold weights in f32, single bf16 cast (nn.Linear weights are [out, in]) ---
    wq_h = (params["wq"].T * scale).reshape(D, H, hd)            # (D, H, hd), scale folded
    wk_h = params["wkv"][:D, :].T.reshape(D, H, hd)              # (D, H, hd)
    wv_h = params["wkv"][D:, :].T.reshape(D, H, hd)              # (D, H, hd)
    wp_h = params["wproj"].T.reshape(H, hd, D)                   # (H, hd, D)
    wqk = jnp.einsum('dhf,ehf->hde', wq_h, wk_h).astype(bdt)     # (H, D, D)  Wq Wk^T
    wvp = jnp.einsum('dhf,hfo->hdo', wv_h, wp_h).astype(bdt)     # (H, D, D)  Wv Wproj
    w1_t = params["w1"].T.astype(bdt)                            # (D, Dh)
    w2_t = params["w2"].T.astype(bdt)                            # (Dh, D)

    # --- prologue: norm1 once per token, bf16, with trailing ones column ---
    TN = _choose_tile(N, norm_tile)
    xn_e = pl.pallas_call(
        _norm1_kernel,
        out_shape=jax.ShapeDtypeStruct((B, N, D_EXT), bdt),
        grid=(B, N // TN),
        in_specs=[
            pl.BlockSpec((1, TN, D), lambda b, i: (b, i, 0)),
            pl.BlockSpec((1, D), lambda b, i: (0, 0)),
            pl.BlockSpec((1, D), lambda b, i: (0, 0)),
        ],
        out_specs=pl.BlockSpec((1, TN, D_EXT), lambda b, i: (b, i, 0)),
        compiler_params=pltpu.CompilerParams(
            dimension_semantics=("parallel", "parallel")),
    )(x_cat, row(params["norm1_w"]), row(params["norm1_b"]))

    # --- main fused kernel: flash-style over (batch, q-tile, kv-tile) ---
    TQ = _choose_tile(N, q_tile)
    TK = _choose_tile(N, kv_tile)
    grid = (B, N // TQ, N // TK)

    def const(shape):
        return pl.BlockSpec(shape, lambda b, qi, ki, _s=shape: (0,) * len(_s))

    out = pl.pallas_call(
        _attn_mlp_kernel,
        out_shape=jax.ShapeDtypeStruct((B, N, D), x_cat.dtype),
        grid=grid,
        in_specs=[
            pl.BlockSpec((1, TQ, D_EXT), lambda b, qi, ki: (b, qi, 0)),   # xn (query tiles)
            pl.BlockSpec((1, TK, D_EXT), lambda b, qi, ki: (b, ki, 0)),   # xn (kv tiles)
            const((H, D, D)), const((H, D, D)), const((1, D)),            # Wqk, Wvp, bproj
            const((1, D)), const((1, D)),                                 # norm2 w, b
            const((D, Dh)), const((1, Dh)),                               # W1^T, b1
            const((Dh, D)), const((1, D)),                                # W2^T, b2
        ],
        out_specs=pl.BlockSpec((1, TQ, D), lambda b, qi, ki: (b, qi, 0)),
        scratch_shapes=[
            pltpu.VMEM((H * TQ, D), jnp.bfloat16),   # q~ (bf16: only ever an MXU operand)
            pltpu.VMEM((H * TQ, 1), jnp.float32),    # m (running max)
            pltpu.VMEM((H * TQ, 1), jnp.float32),    # l (running denom)
            pltpu.VMEM((H * TQ, D), jnp.float32),    # token-space accumulator
        ],
        compiler_params=pltpu.CompilerParams(
            dimension_semantics=("parallel", "parallel", "arbitrary"),
            # 512x512 tiles keep the (H*TQ, TK) f32 temporaries small; stay below
            # v7x's 64 MiB physical VMEM (also fine on v5e/v6e's 128 MiB).
            vmem_limit_bytes=56 * 1024 * 1024),
    )(
        xn_e, xn_e,
        wqk, wvp, row(params["bproj"]),
        row(params["norm2_w"]), row(params["norm2_b"]),
        w1_t, row(params["b1"]), w2_t, row(params["b2"]),
    )

    # split back into the original chunks (matches torch.split semantics)
    outs, start = [], 0
    for n in chunk_sizes:
        outs.append(out[:, start:start + n, :])
        start += n
    return outs


# --------------------------- pure-JAX reference ------------------------------
def _reference_forward(x_chunks, params):
    x = jnp.concatenate(x_chunks, axis=1)
    B, N, D = x.shape
    H, hd = NUM_HEADS, D // NUM_HEADS

    def ln(v, w, b):
        mu = v.mean(-1, keepdims=True)
        var = ((v - mu) ** 2).mean(-1, keepdims=True)
        return (v - mu) / jnp.sqrt(var + LN_EPS) * w + b

    xn = ln(x, params["norm1_w"], params["norm1_b"])
    q = xn @ params["wq"].T
    kv = xn @ params["wkv"].T
    k, v = kv[..., :D], kv[..., D:]
    qh = q.reshape(B, N, H, hd).transpose(0, 2, 1, 3)
    kh = k.reshape(B, N, H, hd).transpose(0, 2, 1, 3)
    vh = v.reshape(B, N, H, hd).transpose(0, 2, 1, 3)
    a = jnp.einsum('bhqd,bhkd->bhqk', qh, kh) * hd ** (-0.5)
    p = jax.nn.softmax(a, axis=-1)
    o = jnp.einsum('bhqk,bhkd->bhqd', p, vh).transpose(0, 2, 1, 3).reshape(B, N, D)
    proj = o @ params["wproj"].T + params["bproj"]
    y = proj + proj
    yn = ln(y, params["norm2_w"], params["norm2_b"])
    h1 = jax.nn.gelu(yn @ params["w1"].T + params["b1"], approximate=False)
    h2 = h1 @ params["w2"].T + params["b2"]
    out = y + h2
    outs, start = [], 0
    for c in x_chunks:
        outs.append(out[:, start:start + c.shape[1], :])
        start += c.shape[1]
    return outs


def init_params(key, d_model=D_MODEL, d_hidden=D_HIDDEN):
    ks = jax.random.split(key, 8)
    s = 0.02
    return {
        "norm1_w": jnp.ones((d_model,), jnp.float32),
        "norm1_b": jnp.zeros((d_model,), jnp.float32),
        "norm2_w": jnp.ones((d_model,), jnp.float32),
        "norm2_b": jnp.zeros((d_model,), jnp.float32),
        # nn.Linear weights are [out_features, in_features]
        "wq": s * jax.random.normal(ks[0], (d_model, d_model), jnp.float32),
        "wkv": s * jax.random.normal(ks[1], (2 * d_model, d_model), jnp.float32),
        "wproj": s * jax.random.normal(ks[2], (d_model, d_model), jnp.float32),
        "bproj": s * jax.random.normal(ks[3], (d_model,), jnp.float32),
        "w1": s * jax.random.normal(ks[4], (d_hidden, d_model), jnp.float32),
        "b1": s * jax.random.normal(ks[5], (d_hidden,), jnp.float32),
        "w2": s * jax.random.normal(ks[6], (d_model, d_hidden), jnp.float32),
        "b2": s * jax.random.normal(ks[7], (d_model,), jnp.float32),
    }


if __name__ == "__main__":
    key = jax.random.PRNGKey(0)
    kp, kx0, kx1 = jax.random.split(key, 3)

    B, N0, N1 = 2, 8, 8
    params = init_params(kp)
    x_chunks = [
        jax.random.normal(kx0, (B, N0, D_MODEL), jnp.float32),
        jax.random.normal(kx1, (B, N1, D_MODEL), jnp.float32),
    ]

    outs = jax.block_until_ready(transformer_encoder_layer(x_chunks, params))
    refs = _reference_forward(x_chunks, params)

    assert len(outs) == 2
    assert outs[0].shape == (B, N0, D_MODEL)
    assert outs[1].shape == (B, N1, D_MODEL)
    for o, r in zip(outs, refs):
        assert bool(jnp.all(jnp.isfinite(o)))
        # bf16 MXU operands / f32 accumulation -> loose-but-tight-enough tolerance
        assert bool(jnp.allclose(o, r, atol=2e-2, rtol=2e-2)), \
            float(jnp.max(jnp.abs(o - r)))
    print("KERNEL_OK")
</pallas_src>

<mosaic_0001>
module attributes {stable_mosaic.version = 11 : i64} {
  func.func @_norm1_kernel(%arg0: i32, %arg1: i32, %arg2: memref<1x16x32xf32, #tpu.memory_space<vmem>>, %arg3: memref<1x32xf32, #tpu.memory_space<vmem>>, %arg4: memref<1x32xf32, #tpu.memory_space<vmem>>, %arg5: memref<1x16x33xbf16, #tpu.memory_space<vmem>>) attributes {dimension_semantics = [#tpu.dimension_semantics<parallel>, #tpu.dimension_semantics<parallel>], iteration_bounds = array<i64: 2, 1>, scalar_prefetch = 0 : i64, scratch_operands = 0 : i64, tpu.core_type = #tpu.core_type<tc>, window_params = [{transform_indices = @transform_0, window_bounds = array<i64: 1, 16, 32>}, {pipeline_mode = #tpu.pipeline_mode<synchronous>, transform_indices = @transform_1, window_bounds = array<i64: 1, 32>}, {pipeline_mode = #tpu.pipeline_mode<synchronous>, transform_indices = @transform_2, window_bounds = array<i64: 1, 32>}, {transform_indices = @transform_3, window_bounds = array<i64: 1, 16, 33>}]} {
    %c0 = arith.constant 0 : index
    %c0_0 = arith.constant 0 : index
    %c0_1 = arith.constant 0 : index
    %0 = vector.load %arg2[%c0, %c0_0, %c0_1] : memref<1x16x32xf32, #tpu.memory_space<vmem>>, vector<1x16x32xf32>
    %1 = vector.shape_cast %0 : vector<1x16x32xf32> to vector<16x32xf32>
    %c0_2 = arith.constant 0 : index
    %c0_3 = arith.constant 0 : index
    %2 = vector.load %arg3[%c0_2, %c0_3] : memref<1x32xf32, #tpu.memory_space<vmem>>, vector<1x32xf32>
    %3 = vector.shape_cast %2 : vector<1x32xf32> to vector<32xf32>
    %c0_4 = arith.constant 0 : index
    %c0_5 = arith.constant 0 : index
    %4 = vector.load %arg4[%c0_4, %c0_5] : memref<1x32xf32, #tpu.memory_space<vmem>>, vector<1x32xf32>
    %5 = vector.shape_cast %4 : vector<1x32xf32> to vector<32xf32>
    %cst = arith.constant dense<0.000000e+00> : vector<16xf32>
    %6 = vector.multi_reduction <add>, %1, %cst [1] : vector<16x32xf32> to vector<16xf32>
    %7 = vector.shape_cast %6 : vector<16xf32> to vector<16x1xf32>
    %cst_6 = arith.constant 3.200000e+01 : f32
    %8 = vector.broadcast %cst_6 : f32 to vector<16x1xf32>
    %9 = arith.divf %7, %8 : vector<16x1xf32>
    %10 = vector.broadcast %9 : vector<16x1xf32> to vector<16x32xf32>
    %11 = arith.subf %1, %10 : vector<16x32xf32>
    %12 = arith.mulf %11, %11 : vector<16x32xf32>
    %cst_7 = arith.constant dense<0.000000e+00> : vector<16xf32>
    %13 = vector.multi_reduction <add>, %12, %cst_7 [1] : vector<16x32xf32> to vector<16xf32>
    %14 = vector.shape_cast %13 : vector<16xf32> to vector<16x1xf32>
    %cst_8 = arith.constant 3.200000e+01 : f32
    %15 = vector.broadcast %cst_8 : f32 to vector<16x1xf32>
    %16 = arith.divf %14, %15 : vector<16x1xf32>
    %17 = vector.broadcast %9 : vector<16x1xf32> to vector<16x32xf32>
    %18 = arith.subf %1, %17 : vector<16x32xf32>
    %cst_9 = arith.constant 9.99999974E-6 : f32
    %19 = vector.broadcast %cst_9 : f32 to vector<16x1xf32>
    %20 = arith.addf %16, %19 : vector<16x1xf32>
    %21 = math.rsqrt %20 : vector<16x1xf32>
    %22 = vector.broadcast %21 : vector<16x1xf32> to vector<16x32xf32>
    %23 = arith.mulf %18, %22 : vector<16x32xf32>
    %24 = vector.shape_cast %3 : vector<32xf32> to vector<1x32xf32>
    %25 = vector.broadcast %24 : vector<1x32xf32> to vector<16x32xf32>
    %26 = arith.mulf %23, %25 : vector<16x32xf32>
    %27 = vector.shape_cast %5 : vector<32xf32> to vector<1x32xf32>
    %28 = vector.broadcast %27 : vector<1x32xf32> to vector<16x32xf32>
    %29 = arith.addf %26, %28 : vector<16x32xf32>
    %30 = arith.truncf %29 : vector<16x32xf32> to vector<16x32xbf16>
    %c0_10 = arith.constant 0 : index
    %c0_11 = arith.constant 0 : index
    %c0_12 = arith.constant 0 : index
    %31 = vector.load %arg5[%c0_10, %c0_11, %c0_12] : memref<1x16x33xbf16, #tpu.memory_space<vmem>>, vector<1x16x32xbf16>
    %32 = vector.shape_cast %31 : vector<1x16x32xbf16> to vector<16x32xbf16>
    %33 = vector.shape_cast %30 : vector<16x32xbf16> to vector<1x16x32xbf16>
    tpu.vector_store %arg5[%c0_10, %c0_11, %c0_12], %33 {strides = array<i32>} : memref<1x16x33xbf16, #tpu.memory_space<vmem>>, vector<1x16x32xbf16>,
    %cst_13 = arith.constant 1.000000e+00 : bf16
    %34 = vector.broadcast %cst_13 : bf16 to vector<16x1xbf16>
    %c0_14 = arith.constant 0 : index
    %c0_15 = arith.constant 0 : index
    %c32 = arith.constant 32 : index
    %35 = vector.load %arg5[%c0_14, %c0_15, %c32] : memref<1x16x33xbf16, #tpu.memory_space<vmem>>, vector<1x16x1xbf16>
    %36 = vector.shape_cast %35 : vector<1x16x1xbf16> to vector<16x1xbf16>
    %37 = vector.shape_cast %34 : vector<16x1xbf16> to vector<1x16x1xbf16>
    tpu.vector_store %arg5[%c0_14, %c0_15, %c32], %37 {strides = array<i32>} : memref<1x16x33xbf16, #tpu.memory_space<vmem>>, vector<1x16x1xbf16>,
    return
  }
  func.func @transform_0(%arg0: i32, %arg1: i32) -> (i32, i32, i32) {
    %c0_i32 = arith.constant 0 : i32
    %c0_i32_0 = arith.constant 0 : i32
    return %arg0, %arg1, %c0_i32 : i32, i32, i32
  }
  func.func @transform_1(%arg0: i32, %arg1: i32) -> (i32, i32) {
    %c0_i32 = arith.constant 0 : i32
    %c0_i32_0 = arith.constant 0 : i32
    %c0_i32_1 = arith.constant 0 : i32
    return %c0_i32, %c0_i32_0 : i32, i32
  }
  func.func @transform_2(%arg0: i32, %arg1: i32) -> (i32, i32) {
    %c0_i32 = arith.constant 0 : i32
    %c0_i32_0 = arith.constant 0 : i32
    %c0_i32_1 = arith.constant 0 : i32
    return %c0_i32, %c0_i32_0 : i32, i32
  }
  func.func @transform_3(%arg0: i32, %arg1: i32) -> (i32, i32, i32) {
    %c0_i32 = arith.constant 0 : i32
    %c0_i32_0 = arith.constant 0 : i32
    return %arg0, %arg1, %c0_i32 : i32, i32, i32
  }
}

</mosaic_0001>

<bundles_post_ra>
// kernel: tpu_custom_call.1
= control target key start
LH: loop header
LB: loop body
LE: loop exit
PB: predicated region body
PF: predicated region fallthrough
CT: control target
= control target key end

     0   :  { %8 = vsyncpa [#allocation3], 0  ;;  %s796_s0 = inlined_call_operand.hbm [shape: f32[2,16,32], index: 0, kind: input, shape index: {}]   ;;  %s797_s1 = inlined_call_operand.vmem [shape: f32[1,32], index: 1, kind: input, shape index: {}]   ;;  %s798_s2 = inlined_call_operand.vmem [shape: f32[1,32], index: 2, kind: input, shape index: {}]   ;;  %s799_s3 = inlined_call_operand.hbm [shape: bf16[2,16,33], index: 3, kind: output, shape index: {}]  }
   0x1   :  { %10 = vsyncpa [#allocation3 + $0x1], 0 }
   0x2   :  { %11 = vsyncpa [#allocation4], 0 }
   0x3   :  { %13 = vsyncpa [#allocation4 + $0x1], 0  ;;  %s610_s12 = smov 0   ;;  %s612_s13 = smov 0  }
   0x4   :  { %s614_s14 = smov 0   ;;  %s616_s15 = smov 0  }
   0x5   :  { %s618_s16 = smov 0   ;;  %s620_s17 = smov 0  }
   0x6 LB: > { %s375_s18 = sadd.s32 4294967295, %s581_s17   ;;  %s376_s19 = sadd.s32 4294967294, %s581_s17   ;;  %s581_s17 = sphi %s620_s17, %s19_s17   ;;  %s577_s16 = sphi %s618_s16, %s814_s16   ;;  %s573_s15 = sphi %s616_s15, %s813_s15   ;;  %s569_s14 = sphi %s614_s14, %s812_s14   ;;  %s565_s13 = sphi %s612_s13, %s811_s13   ;;  %s561_s12 = sphi %s610_s12, %s810_s12  }
   0x7   : > { %s31_s20 = sadd.s32 1, %s577_s16  ;;  %s40_s21 = sadd.s32 1, %s569_s14 }
   0x8   : > { %p33_p0 = scmp.ge.s32.totalorder %s31_s20, 2  ;;  %p47_p1 = scmp.ne.s32.totalorder %s569_s14, %s565_s13 }
   0x9   : > { %p48_p2 = scmp.eq.s32.totalorder %s581_s17, 0  ;;  %p53_p3 = scmp.ne.s32.totalorder %s565_s13, %s561_s12 }
   0xa   : > { %s816_s20 = smov (%p33_p0, %s31_s20), 0  ;;  %p54_p5 = scmp.eq.s32.totalorder %s375_s18, 0 }
   0xb   : > { %p651_p4 = por %p48_p2, %p47_p1  ;;  %s35_s23 = ssub.s32 %s577_s16, %s816_s20 }
   0xc   : > { %p121_p6 = scmp.eq.s32.totalorder %s375_s18, 1  ;;  %p38_p7 = scmp.eq.s32.totalorder %s35_s23, 0 }
   0xd   : > { %p657_p8 = por %p54_p5, %p53_p3  ;;  %p127_p10 = scmp.eq.s32.totalorder %s376_s19, 1 }
   0xe   : > { %p661_p9 = por %p121_p6, %p47_p1  ;;  %p410_p13 = scmp.lt.s32.totalorder %s581_s17, 2 }
   0xf   : > { %s666_s26 = scalar_select %p38_p7, %s569_s14, %s40_s21  }
  0x10   : > { %s803_s25 = scalar_select %p661_p9, 1, 0 }
  0x11   : > { %p668_p11 = por %p127_p10, %p53_p3  ;;  %s153_s28 = sand.u32 1, %s569_s14  }
  0x12   : > { %s379_s29 = sshll.u32 %s153_s28, 4  ;;  %s394_s30 = sshll.u32 %s577_s16, 8 }
  0x13   : > { %s804_s27 = scalar_select %p668_p11, 1, 0 }
  0x14   : > { %s679_s6 = scalar_lea.hbm %s796_s0, %s394_s30  ;;  %s157_s7 = scalar_lea.vmem [#allocation2], %s379_s29 }
  0x15   : > { %s166_s8 = sshll.u32 %s157_s7, 4  ;;  %p685_p0 = pnand %p410_p13, %p651_p4  ;;  %s681_s8 = int_to_ptr.vmem [resolvable:$true] %s166_s8 }
  0x16   : > { %s690_s10 = scalar_lea.sflag [#allocation3], %s153_s28  ;;  %s469_s11 = scalar_lea.hbm %s679_s6, 256 }
  0x17   : > { %p470_p2 = scmp.ne.s32.totalorder %s679_s6, %s469_s11  ;;  %p471_p3 = pneg %p685_p0 }
  0x18   : > { %s474_s21 = scalar_lea.hbm %s796_s0, 512  ;;  %p475_p4 = scmp.lt.u32.totalorder %s679_s6, %s796_s0 }
  0x19   : > { %p472_p5 = pnand %p471_p3, %p470_p2  ;;  %p476_p7 = scmp.lt.u32.totalorder %s474_s21, %s469_s11 }
  0x1a   : > { %p478_p13 = scmp.lt.u32.totalorder %s469_s11, %s679_s6 }
  0x1b   : > { %p473_p6 = pneg %p472_p5  ;;  %p477_p10 = por %p476_p7, %p475_p4 }
  0x1d   : > { %p479_p12 = por %p478_p13, %p477_p10 }
  0x1f   : > { %p480_p1 = pnand %p479_p12, %p473_p6 }
  0x21   : > { %483 = shalt.err (!%p480_p1)
}
  0x22   : > { %s484_s28 = scalar_lea.vmem %s681_s8, 256  ;;  %s583_s29 = smov [#allocation2]  }
  0x23   : > { %p485_p2 = scmp.ne.s32.totalorder %s681_s8, %s484_s28  ;;  %s489_s30 = sshll.u32 %s583_s29, 4  ;;  %s490_s30 = int_to_ptr.vmem [resolvable:$false] %s489_s30 }
  0x24   : > { %s491_s4 = scalar_lea.vmem %s490_s30, 512  ;;  %p492_p9 = scmp.lt.s32.totalorder %s681_s8, %s490_s30 }
  0x25   : > { %p487_p5 = pnand %p485_p2, %p471_p3  ;;  %p493_p4 = scmp.lt.s32.totalorder %s491_s4, %s484_s28 }
  0x27   : > { %p488_p11 = pneg %p487_p5  ;;  %p494_p7 = por %p493_p4, %p492_p9 }
  0x29   : > { %p495_p10 = pnand %p494_p7, %p488_p11 }
  0x2b   : > { %498 = shalt.err (!%p495_p10)
}
  0x2c   : > { %s584_s5 = smov 128   ;;  %s585_s7 = smov 8  }
  0x2d   : > { %405 = dma.hbm_to_vmem [thread:$0]  (!%p685_p0), %s679_s6, 256, %s681_s8, %s690_s10, %s584_s5, %s584_s5, %s585_s7  }
  0x2e   : > { %p174_p12 = scmp.lt.s32.totalorder %s581_s17, 3  ;;  %p806_p1 = scmp.ge.s32.totalorder %s581_s17, 1 }
  0x30   : > { %p175_p3 = pnand %p806_p1, %p174_p12 }
  0x31   : > { %s722_s11 = sand.u32 (!%p175_p3), 1, %s565_s13  }
  0x32   : > { %178 = sbr.rel (%p175_p3) target bundleno = 394 (0x18a), region = 32  ;;  %s383_s18 = sshll.u32 (!%p175_p3), %s722_s11, 4 }
  0x33   : > { %s181_s19 = scalar_lea.sflag (!%p175_p3), [#allocation3], %s722_s11  ;;  %s184_s21 = scalar_lea.vmem (!%p175_p3), [#allocation2], %s383_s18 }
  0x39   : > { %552 = dma.done.wait (%p657_p8), %s181_s19, 256  }
  0x3a   : > { %554 = vsyncadd (%p657_p8), %s181_s19, 4294967040  ;;  %vm214_vm0 = vcmask 261120   ;;  %v210_v0 = vld [vmem:[%s184_s21] sm:$0xff]  ;;  %v211_v1 = vld [vmem:[%s184_s21 + $0x8] sm:$0xff]  ;;  %s384_s10 = sshll.u32 %s722_s11, 3  ;;  %vm266_vm1 = vcmask 257024  }
  0x3b   : > { %v215_v2 = vsel %vm214_vm0, %v210_v0, 0.0  ;;  %v218_v3 = vsel %vm214_vm0, %v211_v1, 0.0  ;;  %v385_v21 = vld [vmem:[%s797_s1] ss:$0 sm:$0xff]  ;;  %vm269_vm2 = vcmask 265472   ;;  %s397_s22 = sshll.u32 %s573_s15, 7 }
  0x3c   : > { %216 = vadd.xlane.f32.xlu0 %v215_v2  ;;  %v386_v23 = vld [vmem:[%s798_s2] ss:$0 sm:$0xff]  ;;  %s206_s23 = scalar_lea.vmem [#allocation5], %s384_s10  ;;  %v586_v31 = vmov 1065369472   ;;  %s745_s4 = scalar_lea.hbm %s799_s3, %s397_s22 }
  0x3d   : > { %s288_s28 = sshll.u32 %s206_s23, 4  ;;  %s273_s15 = scalar_lea.sflag [#allocation4], %s722_s11  ;;  %s747_s28 = int_to_ptr.vmem [resolvable:$true] %s288_s28 }
  0x3e   : > { %s499_s5 = scalar_lea.vmem %s747_s28, 128  ;;  %p807_p9 = scmp.ne.s32.totalorder %s803_s25, 0 }
  0x3f   : > { %p500_p8 = scmp.ne.s32.totalorder %s747_s28, %s499_s5  ;;  %s587_s7 = smov [#allocation5]  }
  0x40   : > { %219 = vadd.xlane.f32.xlu0 %v218_v3  ;;  %s503_s18 = sshll.u32 %s587_s7, 4  ;;  %s504_s18 = int_to_ptr.vmem [resolvable:$false] %s503_s18 }
  0x41   : > { %p501_p11 = pnand %p500_p8, %p807_p9  ;;  %s505_s19 = scalar_lea.vmem %s504_s18, 256 }
  0x42   : > { %p506_p6 = scmp.lt.s32.totalorder %s747_s28, %s504_s18  ;;  %p507_p13 = scmp.lt.s32.totalorder %s505_s19, %s499_s5 }
  0x43   : > { %p502_p0 = pneg %p501_p11 }
  0x44   : > { %p508_p2 = por %p507_p13, %p506_p6 }
  0x46   : > { %p509_p5 = pnand %p508_p2, %p502_p0 }
  0xc9   : > { %v217_v4 = vpop.xlane.xlu0 %216 }
  0xca   : > { %v222_v5 = vmul.f32 0.03125, %v217_v4 }
  0xcc   : > { %v224_v6 = vsub.f32 %v210_v0, %v222_v5 }
  0xcd   : > { %v220_v7 = vpop.xlane.xlu0 %219 }
  0xce   : > { %v223_v8 = vmul.f32 0.03125, %v220_v7  ;;  %v226_v9 = vmul.f32 %v224_v6, %v224_v6 }
  0xd0   : > { %v225_v10 = vsub.f32 %v211_v1, %v223_v8  ;;  %v228_v11 = vsel %vm214_vm0, %v226_v9, 0.0 }
  0xd1   : > { %229 = vadd.xlane.f32.xlu1 %v228_v11 }
  0xd2   : > { %v227_v12 = vmul.f32 %v225_v10, %v225_v10 }
  0xd4   : > { %v231_v13 = vsel %vm214_vm0, %v227_v12, 0.0 }
  0xd5   : > { %232 = vadd.xlane.f32.xlu1 %v231_v13 }
 0x15e   : > { %v230_v14 = vpop.xlane.xlu1 %229 }
 0x15f   : > { %v234_v15 = vmul.f32 0.03125, %v230_v14 }
 0x161   : > { %v236_v16 = vadd.f32 1e-05, %v234_v15 }
 0x162   : > { %v233_v17 = vpop.xlane.xlu1 %232 }
 0x163   : > { %465 = vrsqrt.f32 %v236_v16  ;;  %v235_v18 = vmul.f32 0.03125, %v233_v17 }
 0x165   : > { %v237_v19 = vadd.f32 1e-05, %v235_v18 }
 0x167   : > { %467 = vrsqrt.f32 %v237_v19 }
 0x16d   : > { %v466_v20 = vpop.eup %465 }
 0x16e   : > { %v240_v22 = vmul.f32 %v466_v20, %v224_v6 }
 0x170   : > { %v248_v24 = vmul.f32 %v385_v21, %v240_v22 }
 0x171   : > { %v468_v25 = vpop.eup %467 }
 0x172   : > { %v256_v26 = vadd.f32 %v386_v23, %v248_v24  ;;  %v241_v27 = vmul.f32 %v468_v25, %v225_v10 }
 0x174   : > { %v395_v28 = vpack.c.bf16 %v256_v26, %v256_v26  ;;  %v249_v29 = vmul.f32 %v385_v21, %v241_v27 }
 0x176   : > { %v257_v30 = vadd.f32 %v386_v23, %v249_v29  ;;  %267 = vst.msk [vmem:[%s206_s23] sm:$0xf] %vm266_vm1, %v395_v28 }
 0x177   : > { %270 = vst.msk [vmem:[%s206_s23] sm:$0xf] %vm269_vm2, %v586_v31 }
 0x178   : > { %v396_v32 = vpack.c.bf16 %v257_v30, %v257_v30 }
 0x17a   : > { %268 = vst.msk [vmem:[%s206_s23 + $0x4] sm:$0xf] %vm266_vm1, %v396_v32 }
 0x17b   : > { %271 = vst.msk [vmem:[%s206_s23 + $0x4] sm:$0xf] %vm269_vm2, %v586_v31 }
 0x17c   : > { %512 = shalt.err (!%p509_p5)
}
 0x17d   : > { %s513_s21 = scalar_lea.hbm %s745_s4, 128  ;;  %s517_s8 = scalar_lea.hbm %s799_s3, 256 }
 0x17e   : > { %p514_p4 = scmp.ne.s32.totalorder %s745_s4, %s513_s21  ;;  %p518_p12 = scmp.lt.u32.totalorder %s745_s4, %s799_s3 }
 0x17f   : > { %p519_p1 = scmp.lt.u32.totalorder %s517_s8, %s513_s21  ;;  %p521_p8 = scmp.lt.u32.totalorder %s513_s21, %s745_s4 }
 0x180   : > { %p515_p7 = pnand %p514_p4, %p807_p9 }
 0x181   : > { %p520_p3 = por %p519_p1, %p518_p12 }
 0x182   : > { %p516_p10 = pneg %p515_p7 }
 0x183   : > { %p522_p11 = por %p521_p8, %p520_p3 }
 0x185   : > { %p523_p0 = pnand %p522_p11, %p516_p10 }
 0x187   : > { %526 = shalt.err (!%p523_p0)
}
 0x188   : > { %s588_s22 = smov 64   ;;  %s589_s23 = smov 4  }
 0x189   : > { %400 = dma.vmem_to_hbm [thread:$0]  (%p807_p9), %s747_s28, 128, %s745_s4, %s273_s15, %s588_s22, %s588_s22, %s589_s23  }
 0x18a PF: > { %s303_s29 = sand.u32 1, %s561_s12   ;;  %p808_p6 = scmp.ne.s32.totalorder %s804_s27, 0 }
 0x18b   : > { %p809_p13 = scmp.ge.s32.totalorder %s581_s17, 2  ;;  %s304_s30 = scalar_lea.sflag [#allocation4], %s303_s29 }
 0x18d   : > { %p407_p2 = pnand %p809_p13, %p808_p6 }
 0x18f   : > { %556 = dma.done.wait (!%p407_p2), %s304_s30, 128  }
 0x190   : > { %558 = vsyncadd (!%p407_p2), %s304_s30, 4294967168  ;;  %s19_s17 = sadd.s32 1, %s581_s17   ;;  %s810_s12 = smov %s565_s13 }
 0x191   : > { %p16_p5 = scmp.ge.s32.totalorder %s19_s17, 4   ;;  %s811_s13 = smov %s569_s14 }
 0x192   : > { %s812_s14 = smov %s666_s26  ;;  %s813_s15 = smov %s577_s16 }
 0x193   : > { %s814_s16 = smov %s816_s20  ;;  %18 = sbr.rel (!%p16_p5) target bundleno = 6 (0x6), region = 77 }
 0x19a   :  { %309 = vsyncpa [#allocation3], 1 }
 0x19b   :  { %311 = vsyncpa [#allocation3 + $0x1], 1 }
 0x19c   :  { %312 = vsyncpa [#allocation4], 1 }
 0x19d   :  { %314 = vsyncpa [#allocation4 + $0x1], 1 }

</bundles_post_ra>
